<compile_context>
chip_gen: v7x
topology: tpu7x:2x2x1
jax: 0.10.0
libtpu: 0.0.40
codegen_flags: <defaults>
</compile_context>

<pallas_src>
import jax
import jax.numpy as jnp
from jax.experimental import pallas as pl
from jax.experimental.pallas import tpu as pltpu

D_TEXT = 768          # DistilBERT hidden size (CLS embedding)
D_IMG = 1000          # ResNet50 logits size (kept at natural width)
HIDDEN = 100
HIDDEN_PAD = 128      # padded hidden -> full-lane vregs / MXU columns
N_CLASS = 2
N_CLASS_PAD = 128     # lane-dense output slab (sliced to 2 in the wrapper)

MAX_TILE = 1024       # max batch-tile rows (review: sweep 512-1024)


def _round_up(x, m):
    return ((x + m - 1) // m) * m


def _choose_tiling(B):
    """Pick (tile_rows, n_tiles) with <= ~16 rows of boundary waste."""
    b16 = _round_up(max(B, 1), 16)          # bf16 sublane packing granularity
    if b16 <= 256:
        return b16, 1
    # >= 2 tiles so the parallel grid axis can shard across v7x's 2 TCs;
    # cap the tile at MAX_TILE rows to amortize the ~0.35us per-step overhead.
    n_tiles = max(2, pl.cdiv(b16, MAX_TILE))
    tm = _round_up(pl.cdiv(b16, n_tiles), 16)
    return tm, pl.cdiv(b16, tm)


def _head_kernel(xt_ref, xi_ref, w1t_ref, w1i_ref, b1_ref, w2_ref, b2_ref, o_ref):
    """Fused head on one batch tile: split-K matmul -> +b1 -> relu -> matmul -> +b2."""
    # In-kernel f32 -> bf16 cast of the activations (native bf16 MXU path,
    # f32 accumulation); avoids a separate wrapper-side cast pass over HBM.
    xt = xt_ref[...].astype(jnp.bfloat16)
    xi = xi_ref[...].astype(jnp.bfloat16)
    h = (
        jnp.dot(xt, w1t_ref[...], preferred_element_type=jnp.float32)
        + jnp.dot(xi, w1i_ref[...], preferred_element_type=jnp.float32)
        + b1_ref[...]
    )
    h = jnp.maximum(h, 0.0)  # torch.relu
    # Second matmul is tiny (K=N=128): keep it in f32 for parity with torch.
    out = jnp.dot(h, w2_ref[...], preferred_element_type=jnp.float32) + b2_ref[...]
    o_ref[...] = out.astype(o_ref.dtype)


def prepare_head_params(w1, b1, w2, b2):
    """One-time weight re-layout (hoisted off the per-call path).

    w1: [100, 1768], b1: [100]   (PyTorch Linear layout: [out, in])
    w2: [2, 100],    b2: [2]
    Returns W1 split by modality, transposed to [in, out], hidden padded
    100->128 (zeros are numerically neutral: survive relu and multiply zero
    rows of W2). W1 is bf16 (halves the resident-weight DMA); W2/biases f32.
    """
    w1_t = w1.T                                         # [1768, 100]
    w1_text = jnp.pad(w1_t[:D_TEXT, :],
                      ((0, 0), (0, HIDDEN_PAD - HIDDEN))).astype(jnp.bfloat16)
    w1_img = jnp.pad(w1_t[D_TEXT:, :],
                     ((0, 0), (0, HIDDEN_PAD - HIDDEN))).astype(jnp.bfloat16)
    b1_p = jnp.pad(b1, (0, HIDDEN_PAD - HIDDEN)).reshape(1, HIDDEN_PAD)
    w2_t = jnp.pad(w2.T, ((0, HIDDEN_PAD - HIDDEN), (0, N_CLASS_PAD - N_CLASS)))
    b2_p = jnp.pad(b2, (0, N_CLASS_PAD - N_CLASS)).reshape(1, N_CLASS_PAD)
    return (
        w1_text,                        # [768, 128]  bf16
        w1_img,                         # [1000, 128] bf16
        b1_p.astype(jnp.float32),       # [1, 128]
        w2_t.astype(jnp.float32),       # [128, 128]
        b2_p.astype(jnp.float32),       # [1, 128]
    )


@jax.jit
def caption_error_head(text_cls, image_emb, w1_text, w1_img, b1_p, w2_t, b2_p):
    """text_cls: [B, 768] f32, image_emb: [B, 1000] f32 -> [B, 2] f32."""
    B = text_cls.shape[0]
    tm, n_tiles = _choose_tiling(B)

    act_spec = lambda k: pl.BlockSpec((tm, k), lambda i: (i, 0))
    resident = lambda shape: pl.BlockSpec(shape, lambda i: (0, 0))

    out = pl.pallas_call(
        _head_kernel,
        out_shape=jax.ShapeDtypeStruct((B, N_CLASS_PAD), jnp.bfloat16),
        grid_spec=pltpu.PrefetchScalarGridSpec(
            num_scalar_prefetch=0,
            grid=(n_tiles,),
            in_specs=[
                act_spec(D_TEXT),                       # text activations  (tiled, f32)
                act_spec(D_IMG),                        # image activations (tiled, f32)
                resident((D_TEXT, HIDDEN_PAD)),         # W1 text part  (resident, bf16)
                resident((D_IMG, HIDDEN_PAD)),          # W1 image part (resident, bf16)
                resident((1, HIDDEN_PAD)),              # b1
                resident((HIDDEN_PAD, N_CLASS_PAD)),    # W2
                resident((1, N_CLASS_PAD)),             # b2
            ],
            out_specs=pl.BlockSpec((tm, N_CLASS_PAD), lambda i: (i, 0)),
        ),
        compiler_params=pltpu.CompilerParams(
            dimension_semantics=("parallel",),
            vmem_limit_bytes=32 * 1024 * 1024,
        ),
    )(text_cls, image_emb, w1_text, w1_img, b1_p, w2_t, b2_p)

    # Slice the 2 real classes out of the lane-dense slab; return f32 logits.
    return out[:, :N_CLASS].astype(jnp.float32)


def _reference(text_cls, image_emb, w1, b1, w2, b2):
    cat = jnp.concatenate([text_cls, image_emb], axis=1)
    h = jnp.maximum(cat @ w1.T + b1, 0.0)
    return h @ w2.T + b2


if __name__ == "__main__":
    key = jax.random.PRNGKey(0)
    k_xt, k_xi, k_w1, k_b1, k_w2, k_b2 = jax.random.split(key, 6)

    B = 2

    # Backbone outputs (stand-ins for DistilBERT CLS / ResNet50 logits).
    text_cls = jax.random.normal(k_xt, (B, D_TEXT), dtype=jnp.float32)
    image_emb = jax.random.normal(k_xi, (B, D_IMG), dtype=jnp.float32)

    # Deterministic parameter init mimicking nn.Linear (uniform +-1/sqrt(fan_in)).
    bound1 = 1.0 / jnp.sqrt(jnp.float32(D_TEXT + D_IMG))
    w1 = jax.random.uniform(k_w1, (HIDDEN, D_TEXT + D_IMG), jnp.float32,
                            minval=-bound1, maxval=bound1)
    b1 = jax.random.uniform(k_b1, (HIDDEN,), jnp.float32,
                            minval=-bound1, maxval=bound1)
    bound2 = 1.0 / jnp.sqrt(jnp.float32(HIDDEN))
    w2 = jax.random.uniform(k_w2, (N_CLASS, HIDDEN), jnp.float32,
                            minval=-bound2, maxval=bound2)
    b2 = jax.random.uniform(k_b2, (N_CLASS,), jnp.float32,
                            minval=-bound2, maxval=bound2)

    # One-time weight re-layout (off the per-call path).
    params = prepare_head_params(w1, b1, w2, b2)

    out = caption_error_head(text_cls, image_emb, *params)
    out = jax.block_until_ready(out)

    ref = _reference(text_cls, image_emb, w1, b1, w2, b2)
    assert out.shape == (B, N_CLASS), out.shape
    # bf16 activations/W1 (f32 accumulation) + bf16 output -> looser tolerance.
    assert jnp.allclose(out, ref, atol=5e-2, rtol=5e-2), (out, ref)

    print("KERNEL_OK")
</pallas_src>

<mosaic_0001>
module attributes {stable_mosaic.version = 11 : i64} {
  func.func @_head_kernel(%arg0: i32, %arg1: memref<16x768xf32, #tpu.memory_space<vmem>>, %arg2: memref<16x1000xf32, #tpu.memory_space<vmem>>, %arg3: memref<768x128xbf16, #tpu.memory_space<vmem>>, %arg4: memref<1000x128xbf16, #tpu.memory_space<vmem>>, %arg5: memref<1x128xf32, #tpu.memory_space<vmem>>, %arg6: memref<128x128xf32, #tpu.memory_space<vmem>>, %arg7: memref<1x128xf32, #tpu.memory_space<vmem>>, %arg8: memref<16x128xbf16, #tpu.memory_space<vmem>>) attributes {dimension_semantics = [#tpu.dimension_semantics<parallel>], iteration_bounds = array<i64: 1>, scalar_prefetch = 0 : i64, scratch_operands = 0 : i64, tpu.core_type = #tpu.core_type<tc>, window_params = [{transform_indices = @transform_0, window_bounds = array<i64: 16, 768>}, {transform_indices = @transform_1, window_bounds = array<i64: 16, 1000>}, {pipeline_mode = #tpu.pipeline_mode<synchronous>, transform_indices = @transform_2, window_bounds = array<i64: 768, 128>}, {pipeline_mode = #tpu.pipeline_mode<synchronous>, transform_indices = @transform_3, window_bounds = array<i64: 1000, 128>}, {pipeline_mode = #tpu.pipeline_mode<synchronous>, transform_indices = @transform_4, window_bounds = array<i64: 1, 128>}, {pipeline_mode = #tpu.pipeline_mode<synchronous>, transform_indices = @transform_5, window_bounds = array<i64: 128, 128>}, {pipeline_mode = #tpu.pipeline_mode<synchronous>, transform_indices = @transform_6, window_bounds = array<i64: 1, 128>}, {transform_indices = @transform_7, window_bounds = array<i64: 16, 128>}]} {
    %c0 = arith.constant 0 : index
    %c0_0 = arith.constant 0 : index
    %0 = vector.load %arg1[%c0, %c0_0] : memref<16x768xf32, #tpu.memory_space<vmem>>, vector<16x768xf32>
    %1 = arith.truncf %0 : vector<16x768xf32> to vector<16x768xbf16>
    %c0_1 = arith.constant 0 : index
    %c0_2 = arith.constant 0 : index
    %2 = vector.load %arg2[%c0_1, %c0_2] : memref<16x1000xf32, #tpu.memory_space<vmem>>, vector<16x1000xf32>
    %3 = arith.truncf %2 : vector<16x1000xf32> to vector<16x1000xbf16>
    %c0_3 = arith.constant 0 : index
    %c0_4 = arith.constant 0 : index
    %4 = vector.load %arg3[%c0_3, %c0_4] : memref<768x128xbf16, #tpu.memory_space<vmem>>, vector<768x128xbf16>
    %cst = arith.constant dense<0.000000e+00> : vector<16x128xf32>
    %5 = tpu.matmul %1, %4, %cst {dimension_numbers = #tpu.dot_dimension_numbers<[1], [0], [0], [1], [0, 0, 1, 1], [], []>} : vector<16x768xbf16>, vector<768x128xbf16>, vector<16x128xf32> -> vector<16x128xf32>
    %c0_5 = arith.constant 0 : index
    %c0_6 = arith.constant 0 : index
    %6 = vector.load %arg4[%c0_5, %c0_6] : memref<1000x128xbf16, #tpu.memory_space<vmem>>, vector<1000x128xbf16>
    %cst_7 = arith.constant dense<0.000000e+00> : vector<16x128xf32>
    %7 = tpu.matmul %3, %6, %cst_7 {dimension_numbers = #tpu.dot_dimension_numbers<[1], [0], [0], [1], [0, 0, 1, 1], [], []>} : vector<16x1000xbf16>, vector<1000x128xbf16>, vector<16x128xf32> -> vector<16x128xf32>
    %8 = arith.addf %5, %7 : vector<16x128xf32>
    %c0_8 = arith.constant 0 : index
    %c0_9 = arith.constant 0 : index
    %9 = vector.load %arg5[%c0_8, %c0_9] : memref<1x128xf32, #tpu.memory_space<vmem>>, vector<1x128xf32>
    %10 = vector.broadcast %9 : vector<1x128xf32> to vector<16x128xf32>
    %11 = arith.addf %8, %10 : vector<16x128xf32>
    %cst_10 = arith.constant 0.000000e+00 : f32
    %12 = vector.broadcast %cst_10 : f32 to vector<16x128xf32>
    %13 = arith.maximumf %11, %12 : vector<16x128xf32>
    %c0_11 = arith.constant 0 : index
    %c0_12 = arith.constant 0 : index
    %14 = vector.load %arg6[%c0_11, %c0_12] : memref<128x128xf32, #tpu.memory_space<vmem>>, vector<128x128xf32>
    %cst_13 = arith.constant dense<0.000000e+00> : vector<16x128xf32>
    %15 = tpu.matmul %13, %14, %cst_13 {dimension_numbers = #tpu.dot_dimension_numbers<[1], [0], [0], [1], [0, 0, 1, 1], [], []>} : vector<16x128xf32>, vector<128x128xf32>, vector<16x128xf32> -> vector<16x128xf32>
    %c0_14 = arith.constant 0 : index
    %c0_15 = arith.constant 0 : index
    %16 = vector.load %arg7[%c0_14, %c0_15] : memref<1x128xf32, #tpu.memory_space<vmem>>, vector<1x128xf32>
    %17 = vector.broadcast %16 : vector<1x128xf32> to vector<16x128xf32>
    %18 = arith.addf %15, %17 : vector<16x128xf32>
    %19 = arith.truncf %18 : vector<16x128xf32> to vector<16x128xbf16>
    %c0_16 = arith.constant 0 : index
    %c0_17 = arith.constant 0 : index
    %20 = vector.load %arg8[%c0_16, %c0_17] : memref<16x128xbf16, #tpu.memory_space<vmem>>, vector<16x128xbf16>
    tpu.vector_store %arg8[%c0_16, %c0_17], %19 {strides = array<i32>} : memref<16x128xbf16, #tpu.memory_space<vmem>>, vector<16x128xbf16>,
    return
  }
  func.func @transform_0(%arg0: i32) -> (i32, i32) {
    %c0_i32 = arith.constant 0 : i32
    %c0_i32_0 = arith.constant 0 : i32
    return %arg0, %c0_i32 : i32, i32
  }
  func.func @transform_1(%arg0: i32) -> (i32, i32) {
    %c0_i32 = arith.constant 0 : i32
    %c0_i32_0 = arith.constant 0 : i32
    return %arg0, %c0_i32 : i32, i32
  }
  func.func @transform_2(%arg0: i32) -> (i32, i32) {
    %c0_i32 = arith.constant 0 : i32
    %c0_i32_0 = arith.constant 0 : i32
    %c0_i32_1 = arith.constant 0 : i32
    return %c0_i32, %c0_i32_0 : i32, i32
  }
  func.func @transform_3(%arg0: i32) -> (i32, i32) {
    %c0_i32 = arith.constant 0 : i32
    %c0_i32_0 = arith.constant 0 : i32
    %c0_i32_1 = arith.constant 0 : i32
    return %c0_i32, %c0_i32_0 : i32, i32
  }
  func.func @transform_4(%arg0: i32) -> (i32, i32) {
    %c0_i32 = arith.constant 0 : i32
    %c0_i32_0 = arith.constant 0 : i32
    %c0_i32_1 = arith.constant 0 : i32
    return %c0_i32, %c0_i32_0 : i32, i32
  }
  func.func @transform_5(%arg0: i32) -> (i32, i32) {
    %c0_i32 = arith.constant 0 : i32
    %c0_i32_0 = arith.constant 0 : i32
    %c0_i32_1 = arith.constant 0 : i32
    return %c0_i32, %c0_i32_0 : i32, i32
  }
  func.func @transform_6(%arg0: i32) -> (i32, i32) {
    %c0_i32 = arith.constant 0 : i32
    %c0_i32_0 = arith.constant 0 : i32
    %c0_i32_1 = arith.constant 0 : i32
    return %c0_i32, %c0_i32_0 : i32, i32
  }
  func.func @transform_7(%arg0: i32) -> (i32, i32) {
    %c0_i32 = arith.constant 0 : i32
    %c0_i32_0 = arith.constant 0 : i32
    return %arg0, %c0_i32 : i32, i32
  }
}

</mosaic_0001>

<bundles_post_ra>
// kernel: caption_error_head.1
= control target key start
LH: loop header
LB: loop body
LE: loop exit
PB: predicated region body
PF: predicated region fallthrough
CT: control target
= control target key end

     0   :  { %12 = vsyncpa [#allocation3], 0  ;;  %s2659_s0 = inlined_call_operand.hbm [shape: f32[2,768], index: 0, kind: input, shape index: {}]   ;;  %s2660_s1 = inlined_call_operand.hbm [shape: f32[2,1000], index: 1, kind: input, shape index: {}]   ;;  %s2661_s2 = inlined_call_operand.hbm [shape: bf16[768,128], index: 2, kind: input, shape index: {}]   ;;  %s2662_s3 = inlined_call_operand.hbm [shape: bf16[1000,128], index: 3, kind: input, shape index: {}]   ;;  %s2663_s4 = inlined_call_operand.vmem [shape: f32[1,128], index: 4, kind: input, shape index: {}]   ;;  %s2664_s5 = inlined_call_operand.hbm [shape: f32[128,128], index: 5, kind: input, shape index: {}]   ;;  %s2665_s6 = inlined_call_operand.vmem [shape: f32[1,128], index: 6, kind: input, shape index: {}]   ;;  %s2666_s7 = inlined_call_operand.vmem [shape: bf16[2,128], index: 7, kind: output, shape index: {}]  }
   0x1   :  { %13 = vsyncpa [#allocation5], 0 }
   0x2   :  { %14 = vsyncpa [#allocation8], 0 }
   0x3   :  { %19 = vsyncadd [#allocation3], 1344  ;;  %s2469_s24 = smov [#allocation2]   ;;  %s2353_s28 = scalar_lea.hbm %s2659_s0, 192 }
   0x4   :  { %s20_s25 = sshll.u32 %s2469_s24, 4  ;;  %p2354_p0 = scmp.ne.s32.totalorder %s2659_s0, %s2353_s28  ;;  %s21_s25 = int_to_ptr.vmem [resolvable:$true] %s20_s25 }
   0x5   :  { %p2357_p1 = scmp.lt.u32.totalorder %s2353_s28, %s2659_s0 }
   0x7   :  { %p2359_p2 = pnand %p2357_p1, %p2354_p0 }
   0x9   :  { %2362 = shalt.err (!%p2359_p2)
}
   0xa   :  { %s2363_s10 = scalar_lea.vmem %s21_s25, 192  ;;  %s2367_s11 = scalar_lea.vmem %s21_s25, 1536 }
   0xb   :  { %p2364_p3 = scmp.ne.s32.totalorder %s21_s25, %s2363_s10  ;;  %p2368_p4 = scmp.lt.s32.totalorder %s21_s25, %s21_s25 }
   0xc   :  { %p2369_p5 = scmp.lt.s32.totalorder %s2367_s11, %s2363_s10 }
   0xe   :  { %p2370_p6 = por %p2369_p5, %p2368_p4 }
  0x10   :  { %p2371_p7 = pnand %p2370_p6, %p2364_p3 }
  0x12   :  { %2374 = shalt.err (!%p2371_p7)
}
  0x13   :  { %s2470_s12 = smov 192   ;;  %s2471_s13 = smov 12  }
  0x14   :  { %26 = dma.hbm_to_vmem [thread:$0]  %s2659_s0, 192, %s21_s25, [#allocation3], %s2470_s12, %s2470_s12, %s2471_s13  }
  0x15   :  { %31 = vsyncadd [#allocation5], 1792  ;;  %s2472_s16 = smov [#allocation4]   ;;  %s2375_s20 = scalar_lea.hbm %s2660_s1, 256 }
  0x16   :  { %s32_s17 = sshll.u32 %s2472_s16, 4  ;;  %p2376_p8 = scmp.ne.s32.totalorder %s2660_s1, %s2375_s20  ;;  %s33_s17 = int_to_ptr.vmem [resolvable:$true] %s32_s17 }
  0x17   :  { %p2379_p9 = scmp.lt.u32.totalorder %s2375_s20, %s2660_s1 }
  0x19   :  { %p2381_p10 = pnand %p2379_p9, %p2376_p8 }
  0x1b   :  { %2384 = shalt.err (!%p2381_p10)
}
  0x1c   :  { %s2385_s26 = scalar_lea.vmem %s33_s17, 256  ;;  %s2389_s0 = scalar_lea.vmem %s33_s17, 2048 }
  0x1d   :  { %p2386_p11 = scmp.ne.s32.totalorder %s33_s17, %s2385_s26  ;;  %p2390_p12 = scmp.lt.s32.totalorder %s33_s17, %s33_s17 }
  0x1e   :  { %p2391_p13 = scmp.lt.s32.totalorder %s2389_s0, %s2385_s26 }
  0x20   :  { %p2392_p0 = por %p2391_p13, %p2390_p12 }
  0x22   :  { %p2393_p1 = pnand %p2392_p0, %p2386_p11 }
  0x24   :  { %2396 = shalt.err (!%p2393_p1)
}
  0x25   :  { %s2473_s25 = smov 256   ;;  %s2474_s27 = smov 16  }
  0x26   :  { %38 = dma.hbm_to_vmem [thread:$0]  %s2660_s1, 256, %s33_s17, [#allocation5], %s2473_s25, %s2473_s25, %s2474_s27  }
  0x27   :  { %s2475_s30 = smov [#allocation7]   ;;  %s2476_s9 = smov [#allocation6]  }
  0x28   :  { %s56_s8 = sshll.u32 %s2475_s30, 4  ;;  %s44_s10 = sshll.u32 %s2476_s9, 4  ;;  %s57_s8 = int_to_ptr.vmem [resolvable:$true] %s56_s8  ;;  %s45_s10 = int_to_ptr.vmem [resolvable:$true] %s44_s10 }
  0x29   :  { %s2397_s13 = scalar_lea.hbm %s2662_s3, 8000 }
  0x2a   :  { %p2398_p2 = scmp.ne.s32.totalorder %s2662_s3, %s2397_s13  ;;  %p2401_p3 = scmp.lt.u32.totalorder %s2397_s13, %s2662_s3 }
  0x2c   :  { %p2403_p4 = pnand %p2401_p3, %p2398_p2 }
  0x2e   :  { %2406 = shalt.err (!%p2403_p4)
}
  0x2f   :  { %s2407_s1 = scalar_lea.vmem %s57_s8, 8000  ;;  %p2412_p6 = scmp.lt.s32.totalorder %s57_s8, %s57_s8 }
  0x30   :  { %p2408_p5 = scmp.ne.s32.totalorder %s57_s8, %s2407_s1  ;;  %p2413_p7 = scmp.lt.s32.totalorder %s2407_s1, %s2407_s1 }
  0x32   :  { %p2414_p8 = por %p2413_p7, %p2412_p6 }
  0x34   :  { %p2415_p9 = pnand %p2414_p8, %p2408_p5 }
  0x36   :  { %2418 = shalt.err (!%p2415_p9)
}
  0x37   :  { %s2477_s17 = smov 64   ;;  %s2478_s19 = smov 4  }
  0x38   :  { %62 = dma.hbm_to_vmem [thread:$0]  %s2662_s3, 8000, %s57_s8, [#allocation8], %s2477_s17, %s2477_s17, %s2478_s19  }
  0x39   :  { %s2419_s24 = scalar_lea.hbm %s2661_s2, 6144 }
  0x3a   :  { %p2420_p10 = scmp.ne.s32.totalorder %s2661_s2, %s2419_s24  ;;  %p2423_p11 = scmp.lt.u32.totalorder %s2419_s24, %s2661_s2 }
  0x3c   :  { %p2425_p12 = pnand %p2423_p11, %p2420_p10 }
  0x3e   :  { %2428 = shalt.err (!%p2425_p12)
}
  0x3f   :  { %s2429_s28 = scalar_lea.vmem %s45_s10, 6144  ;;  %p2434_p0 = scmp.lt.s32.totalorder %s45_s10, %s45_s10 }
  0x40   :  { %p2430_p13 = scmp.ne.s32.totalorder %s45_s10, %s2429_s28  ;;  %p2435_p1 = scmp.lt.s32.totalorder %s2429_s28, %s2429_s28 }
  0x42   :  { %p2436_p2 = por %p2435_p1, %p2434_p0 }
  0x44   :  { %p2437_p3 = pnand %p2436_p2, %p2430_p13 }
  0x46   :  { %2440 = shalt.err (!%p2437_p3)
}
  0x47   :  { %50 = dma.hbm_to_vmem [thread:$0]  %s2661_s2, 6144, %s45_s10, [#allocation5], %s2477_s17, %s2477_s17, %s2478_s19  }
  0x48   :  { %s2479_s30 = smov [#allocation9]   ;;  %s2441_s12 = scalar_lea.hbm %s2664_s5, 2048 }
  0x49   :  { %s70_s8 = sshll.u32 %s2479_s30, 4  ;;  %p2442_p4 = scmp.ne.s32.totalorder %s2664_s5, %s2441_s12  ;;  %s71_s8 = int_to_ptr.vmem [resolvable:$true] %s70_s8 }
  0x4a   :  { %p2445_p5 = scmp.lt.u32.totalorder %s2441_s12, %s2664_s5 }
  0x4c   :  { %p2447_p6 = pnand %p2445_p5, %p2442_p4 }
  0x4e   :  { %2450 = shalt.err (!%p2447_p6)
}
  0x4f   :  { %s2451_s18 = scalar_lea.vmem %s71_s8, 2048  ;;  %p2456_p8 = scmp.lt.s32.totalorder %s71_s8, %s71_s8 }
  0x50   :  { %p2452_p7 = scmp.ne.s32.totalorder %s71_s8, %s2451_s18  ;;  %p2457_p9 = scmp.lt.s32.totalorder %s2451_s18, %s2451_s18 }
  0x52   :  { %p2458_p10 = por %p2457_p9, %p2456_p8 }
  0x54   :  { %p2459_p11 = pnand %p2458_p10, %p2452_p7 }
  0x56   :  { %2462 = shalt.err (!%p2459_p11)
}
  0x57   :  { %s2480_s2 = smov 128   ;;  %s2481_s10 = smov 8  }
  0x58   :  { %76 = dma.hbm_to_vmem [thread:$0]  %s2664_s5, 2048, %s71_s8, [#allocation8], %s2480_s2, %s2480_s2, %s2481_s10  }
  0x59   :  { %2463 = dma.done.wait [#allocation3], 1536  }
  0x5a   :  { %2464 = vsyncadd [#allocation3], 4294965760 }
  0x5b   :  { %2465 = dma.done.wait [#allocation5], 8192  }
  0x5c   :  { %2466 = vsyncadd [#allocation5], 4294959104 }
  0x5d   :  { %2467 = dma.done.wait [#allocation8], 10048  }
  0x5e   :  { %2468 = vsyncadd [#allocation8], 4294957248  ;;  %v2202_v0 = vld [vmem:[#allocation7 + $0x40] sm:$0xff]   ;;  %v2206_v4 = vld [vmem:[#allocation7 + $0x48] sm:$0xff]   ;;  %v2482_v25 = vmov 1983009808   ;;  %v134_v27 = vlaneseq }
  0x5f   :  { %v2203_v1 = vld [vmem:[#allocation7 + $0xc0] sm:$0xff]   ;;  %1969 = vmatprep.subr.bf16.mxu0 %v2202_v0  ;;  %v2207_v5 = vld [vmem:[#allocation7 + $0xc8] sm:$0xff]   ;;  %v2210_v8 = vld [vmem:[#allocation7 + $0x50] sm:$0xff]   ;;  %v132_v26 = vunpack.c.l.s4 %v2482_v25  ;;  %v2483_v39 = vmov 0   ;;  %vm1049_vm0 = vcmask 850944   ;;  %vm1053_vm1 = vcmask 1043456  }
  0x60   :  { %v2204_v2 = vld [vmem:[#allocation7] sm:$0xff]   ;;  %1991 = vmatprep.subr.bf16.mxu1 %v2203_v1  ;;  %v2208_v6 = vld [vmem:[#allocation7 + $0x8] sm:$0xff]   ;;  %v2211_v9 = vld [vmem:[#allocation7 + $0xd0] sm:$0xff]   ;;  %v2585_v33 = vshrl.u32 %v134_v27, 7 }
  0x61   :  { %v2205_v3 = vld [vmem:[#allocation7 + $0x80] sm:$0xff]   ;;  %1970 = vmatpush3.bf16.msra.mxu0 %v2204_v2  ;;  %v2209_v7 = vld [vmem:[#allocation7 + $0x88] sm:$0xff]   ;;  %v2212_v10 = vld [vmem:[#allocation7 + $0x10] sm:$0xff]   ;;  %v133_v32 = vunpack.c.0.s8 %v132_v26 }
  0x62   :  { %1992 = vmatpush3.bf16.msra.mxu1 %v2205_v3  ;;  %1971 = vmatprep.subr.bf16.mxu0 %v2206_v4  ;;  %v2213_v11 = vld [vmem:[#allocation7 + $0x90] sm:$0xff]   ;;  %v2214_v12 = vld [vmem:[#allocation7 + $0x58] sm:$0xff]   ;;  %v2218_v16 = vld [vmem:[#allocation7 + $0x60] sm:$0xff]  }
  0x63   :  { %1993 = vmatprep.subr.bf16.mxu1 %v2207_v5  ;;  %v2215_v13 = vld [vmem:[#allocation7 + $0xd8] sm:$0xff]   ;;  %v2219_v17 = vld [vmem:[#allocation7 + $0xe0] sm:$0xff]   ;;  %v2222_v20 = vld [vmem:[#allocation7 + $0x68] sm:$0xff]   ;;  %v2588_v37 = vsub.s32 %v133_v32, %v2585_v33 }
  0x64   :  { %v2216_v14 = vld [vmem:[#allocation7 + $0x18] sm:$0xff]   ;;  %v2220_v18 = vld [vmem:[#allocation7 + $0x20] sm:$0xff]   ;;  %v2223_v21 = vld [vmem:[#allocation7 + $0xe8] sm:$0xff]  }
  0x65   :  { %1972 = vmatpush3.bf16.msra.mxu0 %v2208_v6  ;;  %v2217_v15 = vld [vmem:[#allocation7 + $0x98] sm:$0xff]   ;;  %v2221_v19 = vld [vmem:[#allocation7 + $0xa0] sm:$0xff]   ;;  %v2224_v22 = vld [vmem:[#allocation7 + $0x28] sm:$0xff]  }
  0x66   :  { %1994 = vmatpush3.bf16.msra.mxu1 %v2209_v7  ;;  %1973 = vmatprep.subr.bf16.mxu0 %v2210_v8  ;;  %v2225_v23 = vld [vmem:[#allocation7 + $0xa8] sm:$0xff]   ;;  %v2226_v24 = vld [vmem:[#allocation7 + $0x70] sm:$0xff]   ;;  %v2230_v31 = vld [vmem:[#allocation7 + $0x78] sm:$0xff]  }
  0x67   :  { %1995 = vmatprep.subr.bf16.mxu1 %v2211_v9  ;;  %v2227_v28 = vld [vmem:[#allocation7 + $0xf0] sm:$0xff]   ;;  %v2231_v34 = vld [vmem:[#allocation7 + $0xf8] sm:$0xff]   ;;  %v2246_v54 = vld [vmem:[#allocation7 + $0x140] sm:$0xff]  }
  0x68   :  { %v2228_v29 = vld [vmem:[#allocation7 + $0x30] sm:$0xff]   ;;  %v2232_v35 = vld [vmem:[#allocation7 + $0x38] sm:$0xff]   ;;  %v2247_v1 = vld [vmem:[#allocation7 + $0x100] sm:$0xff]  }
  0x69   :  { %1974 = vmatpush3.bf16.msra.mxu0 %v2212_v10  ;;  %v2229_v30 = vld [vmem:[#allocation7 + $0xb0] sm:$0xff]   ;;  %v2233_v36 = vld [vmem:[#allocation7 + $0xb8] sm:$0xff]   ;;  %v2249_v3 = vld [vmem:[#allocation7 + $0x148] sm:$0xff]  }
  0x6a   :  { %1996 = vmatpush3.bf16.msra.mxu1 %v2213_v11  ;;  %1975 = vmatprep.subr.bf16.mxu0 %v2214_v12  ;;  %v2234_v38 = vld [vmem:[#allocation4] ss:$16 sps:$4 sm:$0xff]   ;;  %v2242_v44 = vld [vmem:[#allocation4 + $0x4] ss:$16 sps:$4 sm:$0xff]   ;;  %v2250_v7 = vld [vmem:[#allocation7 + $0x108] sm:$0xff]  }
  0x6b   :  { %1997 = vmatprep.subr.bf16.mxu1 %v2215_v13  ;;  %v2236_v40 = vld [vmem:[#allocation4 + $0x20] ss:$16 sps:$4 sm:$0xff]   ;;  %v295_v43 = vrot.slane %v2234_v38, %v2588_v37  ;;  %v2243_v45 = vld [vmem:[#allocation4 + $0x24] ss:$16 sps:$4 sm:$0xff]   ;;  %v302_v51 = vrot.slane %v2242_v44, %v2588_v37  ;;  %v2251_v9 = vld [vmem:[#allocation7 + $0x188] sm:$0xff]  }
  0x6c   :  { %v2238_v41 = vld [vmem:[#allocation4 + $0x40] ss:$16 sps:$4 sm:$0xff]   ;;  %v2244_v46 = vld [vmem:[#allocation4 + $0x44] ss:$16 sps:$4 sm:$0xff]   ;;  %v309_v47 = vrot.slane %v2236_v40, %v2588_v37  ;;  %v316_v52 = vrot.slane %v2243_v45, %v2588_v37  ;;  %v2255_v11 = vld [vmem:[#allocation7 + $0x158] sm:$0xff]  }
  0x6d   :  { %1976 = vmatpush3.bf16.msra.mxu0 %v2216_v14  ;;  %v2240_v42 = vld [vmem:[#allocation4 + $0x60] ss:$16 sps:$4 sm:$0xff]   ;;  %v367_v48 = vrot.slane %v2238_v41, %v2588_v37  ;;  %v2245_v50 = vld [vmem:[#allocation4 + $0x64] ss:$16 sps:$4 sm:$0xff]   ;;  %v374_v53 = vrot.slane %v2244_v46, %v2588_v37  ;;  %v2256_v13 = vld [vmem:[#allocation7 + $0x118] sm:$0xff]  }
  0x6e   :  { %1998 = vmatpush3.bf16.msra.mxu1 %v2217_v15  ;;  %1977 = vmatprep.subr.bf16.mxu0 %v2218_v16  ;;  %v381_v49 = vrot.slane %v2240_v42, %v2588_v37  ;;  %v318_v55 = vcombine.high %v295_v43, %v309_v47  ;;  %v388_v57 = vrot.slane %v2245_v50, %v2588_v37  ;;  %v2248_v6 = vld [vmem:[#allocation7 + $0x180] sm:$0xff]   ;;  %v2252_v8 = vld [vmem:[#allocation7 + $0x150] sm:$0xff]   ;;  %v2257_v15 = vld [vmem:[#allocation7 + $0x198] sm:$0xff]  }
  0x6f   :  { %1999 = vmatprep.subr.bf16.mxu1 %v2219_v17  ;;  %v317_v58 = vcombine.low %v295_v43, %v309_v47  ;;  %v320_v59 = vcombine.high %v302_v51, %v316_v52  ;;  %v319_v61 = vcombine.low %v302_v51, %v316_v52  ;;  %v2253_v10 = vld [vmem:[#allocation7 + $0x110] sm:$0xff]   ;;  %v2258_v14 = vld [vmem:[#allocation7 + $0x160] sm:$0xff]   ;;  %v2261_v17 = vld [vmem:[#allocation7 + $0x168] sm:$0xff]  }
  0x70   :  { %v390_v56 = vcombine.high %v367_v48, %v381_v49  ;;  %v389_v60 = vcombine.low %v367_v48, %v381_v49  ;;  %v392_v63 = vcombine.high %v374_v53, %v388_v57  ;;  %v391_v0 = vcombine.low %v374_v53, %v388_v57  ;;  %v2254_v12 = vld [vmem:[#allocation7 + $0x190] sm:$0xff]   ;;  %v2259_v16 = vld [vmem:[#allocation7 + $0x120] sm:$0xff]   ;;  %v2272_v25 = vld [vmem:[#allocation4 + $0xc] ss:$16 sps:$4 sm:$0xff]  }
  0x71   :  { %1978 = vmatpush3.bf16.msra.mxu0 %v2220_v18  ;;  %v2260_v18 = vld [vmem:[#allocation7 + $0x1a0] sm:$0xff]   ;;  %v2273_v26 = vld [vmem:[#allocation4 + $0x28] ss:$16 sps:$4 sm:$0xff]   ;;  %v2275_v27 = vld [vmem:[#allocation4 + $0x2c] ss:$16 sps:$4 sm:$0xff]  }
  0x72   :  { %2000 = vmatpush3.bf16.msra.mxu1 %v2221_v19  ;;  %1979 = vmatprep.subr.bf16.mxu0 %v2222_v20  ;;  %v446_v62 = vpack.c.bf16 %v390_v56, %v318_v55  ;;  %v445_v2 = vpack.c.bf16 %v389_v60, %v317_v58  ;;  %v448_v4 = vpack.c.bf16 %v392_v63, %v320_v59  ;;  %v2262_v19 = vld [vmem:[#allocation7 + $0x128] sm:$0xff]   ;;  %v2268_v46 = vld [vmem:[#allocation7 + $0x138] sm:$0xff]   ;;  %v2282_v50 = vld [vmem:[#allocation6 + $0x40] sm:$0xff]  }
  0x73   :  { %2001 = vmatprep.subr.bf16.mxu1 %v2223_v21  ;;  %v447_v5 = vpack.c.bf16 %v391_v0, %v319_v61  ;;  %v2263_v20 = vld [vmem:[#allocation7 + $0x1a8] sm:$0xff]   ;;  %v2264_v21 = vld [vmem:[#allocation7 + $0x170] sm:$0xff]   ;;  %v2611_v40 = vrot.slane %v2275_v27, %v2588_v37  ;;  %v2269_v52 = vld [vmem:[#allocation7 + $0x1b8] sm:$0xff]  }
  0x74   :  { %1089 = vmatprep.mubr.bf16.mxu0 %v446_v62  ;;  %1130 = vmatprep.mubr.bf16.mxu1 %v448_v4  ;;  %v2279_v32 = vld [vmem:[#allocation4 + $0x68] ss:$16 sps:$4 sm:$0xff]   ;;  %v2284_v56 = vld [vmem:[#allocation6] sm:$0xff]   ;;  %v2288_v60 = vld [vmem:[#allocation6 + $0x50] sm:$0xff]  }
  0x75   :  { %1980 = vmatpush3.bf16.msra.mxu0 %v2224_v22  ;;  %v2265_v22 = vld [vmem:[#allocation7 + $0x130] sm:$0xff]   ;;  %v417_v43 = vrot.slane %v2279_v32, %v2588_v37  ;;  %v2285_v57 = vld [vmem:[#allocation6 + $0x48] sm:$0xff]   ;;  %v2283_v58 = vld [vmem:[#allocation7 + $0x1c0] sm:$0xff]  }
  0x76   :  { %2002 = vmatpush3.bf16.msra.mxu1 %v2225_v23  ;;  %1981 = vmatprep.subr.bf16.mxu0 %v2226_v24  ;;  %v2267_v23 = vld [vmem:[#allocation7 + $0x178] sm:$0xff]   ;;  %v2287_v59 = vld [vmem:[#allocation6 + $0x8] sm:$0xff]   ;;  %v2290_v62 = vld [vmem:[#allocation6 + $0x10] sm:$0xff]  }
  0x77   :  { %2003 = vmatprep.subr.bf16.mxu1 %v2227_v28  ;;  %v2270_v24 = vld [vmem:[#allocation4 + $0x8] ss:$16 sps:$4 sm:$0xff]   ;;  %v2289_v0 = vld [vmem:[#allocation7 + $0x1d0] sm:$0xff]   ;;  %v2295_v4 = vld [vmem:[#allocation7 + $0x1e0] sm:$0xff]  }
  0x78   :  { %v2276_v28 = vld [vmem:[#allocation4 + $0x48] ss:$16 sps:$4 sm:$0xff]   ;;  %v2316_v32 = vld [vmem:[#allocation6 + $0x140] sm:$0xff]  }
  0x79   :  { %1982 = vmatpush3.bf16.msra.mxu0 %v2228_v29  ;;  %v2278_v29 = vld [vmem:[#allocation4 + $0x4c] ss:$16 sps:$4 sm:$0xff]   ;;  %v403_v38 = vrot.slane %v2276_v28, %v2588_v37 }
  0x7a   :  { %2004 = vmatpush3.bf16.msra.mxu1 %v2229_v30  ;;  %1983 = vmatprep.subr.bf16.mxu0 %v2230_v31  ;;  %v331_v30 = vrot.slane %v2270_v24, %v2588_v37  ;;  %v345_v31 = vrot.slane %v2273_v26, %v2588_v37  ;;  %v2614_v41 = vrot.slane %v2278_v29, %v2588_v37  ;;  %v2286_v61 = vld [vmem:[#allocation7 + $0x1c8] sm:$0xff]   ;;  %v2291_v63 = vld [vmem:[#allocation6 + $0x58] sm:$0xff]   ;;  %v2304_v26 = vld [vmem:[#allocation6 + $0xc0] sm:$0xff]  }
  0x7b   :  { %2005 = vmatprep.subr.bf16.mxu1 %v2231_v34  ;;  %v2281_v34 = vld [vmem:[#allocation4 + $0x6c] ss:$16 sps:$4 sm:$0xff]   ;;  %v426_v48 = vcombine.high %v403_v38, %v417_v43  ;;  %v425_v49 = vcombine.low %v403_v38, %v417_v43  ;;  %v2318_v38 = vld [vmem:[#allocation6 + $0x100] sm:$0xff]   ;;  %v2324_v43 = vld [vmem:[#allocation6 + $0x150] sm:$0xff]  }
  0x7c   :  { %v354_v42 = vcombine.high %v331_v30, %v345_v31  ;;  %v353_v44 = vcombine.low %v331_v30, %v345_v31  ;;  %v2619_v45 = vrot.slane %v2281_v34, %v2588_v37  ;;  %v2305_v29 = vld [vmem:[#allocation6 + $0x38] sm:$0xff]   ;;  %v2306_v34 = vld [vmem:[#allocation6 + $0x80] sm:$0xff]  }
  0x7d   :  { %1984 = vmatpush3.bf16.msra.mxu0 %v2232_v35  ;;  %v2607_v35 = vrot.slane %v2272_v25, %v2588_v37 }
  0x7e   :  { %2006 = vmatpush3.bf16.msra.mxu1 %v2233_v36  ;;  %2013 = vmatprep.subr.bf16.mxu0 %v2246_v54  ;;  %v2266_v36 = vld [vmem:[#allocation7 + $0x1b0] sm:$0xff]   ;;  %v428_v51 = vcombine.high %v2614_v41, %v2619_v45  ;;  %v450_v53 = vpack.c.bf16 %v426_v48, %v354_v42  ;;  %v449_v54 = vpack.c.bf16 %v425_v49, %v353_v44  ;;  %v2322_v42 = vld [vmem:[#allocation6 + $0x108] sm:$0xff]   ;;  %v2325_v48 = vld [vmem:[#allocation6 + $0x98] sm:$0xff]  }
  0x7f   :  { %1180 = vmatprep.subr.bf16.mxu1 %v2483_v39  ;;  %v356_v47 = vcombine.high %v2607_v35, %v2611_v40  ;;  %v2321_v44 = vld [vmem:[#allocation6 + $0x90] sm:$0xff]   ;;  %v2327_v49 = vld [vmem:[#allocation6 + $0xe0] sm:$0xff]  }
  0x80   :  { %1090 = vmatmul.mubr.bf16.vlgmr.msra.gmra.mrb[0].mxu0 %v445_v2  ;;  %v2294_v2 = vld [vmem:[#allocation6 + $0x60] sm:$0xff]  }
  0x81   :  { %2014 = vmatpush3.bf16.msra.mxu0 %v2247_v1  ;;  %1131 = vmatmul.mubr.bf16.vlgmr.msra.gmra.mrb[0].mxu1 %v447_v5  ;;  %v452_v55 = vpack.c.bf16 %v428_v51, %v356_v47  ;;  %v2293_v1 = vld [vmem:[#allocation6 + $0x18] sm:$0xff]   ;;  %v2296_v5 = vld [vmem:[#allocation6 + $0x20] sm:$0xff]  }
  0x82   :  { %2015 = vmatprep.subr.bf16.mxu0 %v2249_v3  ;;  %1181 = vmatpush1.bf16.msra.mxu1 %v2248_v6  ;;  %v2292_v3 = vld [vmem:[#allocation7 + $0x1d8] sm:$0xff]   ;;  %v2297_v6 = vld [vmem:[#allocation6 + $0x68] sm:$0xff]   ;;  %v2332_v51 = vld [vmem:[#allocation6 + $0x160] sm:$0xff]  }
  0x83   :  { %1182 = vmatprep.subr.bf16.mxu1 %v2483_v39  ;;  %1171 = vmatprep.mubr.bf16.mxu0 %v450_v53  ;;  %v2328_v47 = vld [vmem:[#allocation6 + $0x158] sm:$0xff]   ;;  %v2331_v53 = vld [vmem:[#allocation6 + $0xe8] sm:$0xff]  }
  0x84   :  { %1913 = vmatprep.mubr.msk.bf16.mxu1 %vm1049_vm0, %v452_v55  ;;  %v2334_v55 = vld [vmem:[#allocation6 + $0x120] sm:$0xff]  }
  0x85   :  { %2016 = vmatpush3.bf16.msra.mxu0 %v2250_v7  ;;  %v2299_v7 = vld [vmem:[#allocation6 + $0x28] sm:$0xff]  }
  0x86   :  { %2017 = vmatprep.subr.bf16.mxu0 %v2252_v8  ;;  %1183 = vmatpush1.bf16.msra.mxu1 %v2251_v9  ;;  %v2300_v8 = vld [vmem:[#allocation6 + $0x70] sm:$0xff]   ;;  %v2298_v9 = vld [vmem:[#allocation7 + $0x1e8] sm:$0xff]  }
  0x87   :  { %1184 = vmatprep.subr.bf16.mxu1 %v2483_v39 }
  0x89   :  { %2018 = vmatpush3.bf16.msra.mxu0 %v2253_v10  ;;  %v2307_v10 = vld [vmem:[#allocation2] ss:$12 sps:$4 sm:$0xff]  }
  0x8a   :  { %2019 = vmatprep.subr.bf16.mxu0 %v2255_v11  ;;  %1185 = vmatpush1.bf16.msra.mxu1 %v2254_v12  ;;  %v2309_v11 = vld [vmem:[#allocation2 + $0x18] ss:$12 sps:$4 sm:$0xff]   ;;  %v2311_v12 = vld [vmem:[#allocation2 + $0x30] ss:$12 sps:$4 sm:$0xff]  }
  0x8b   :  { %1186 = vmatprep.subr.bf16.mxu1 %v2483_v39 }
  0x8d   :  { %2020 = vmatpush3.bf16.msra.mxu0 %v2256_v13  ;;  %v2313_v13 = vld [vmem:[#allocation2 + $0x48] ss:$12 sps:$4 sm:$0xff]  }
  0x8e   :  { %2021 = vmatprep.subr.bf16.mxu0 %v2258_v14  ;;  %1187 = vmatpush1.bf16.msra.mxu1 %v2257_v15  ;;  %v2301_v14 = vld [vmem:[#allocation7 + $0x1f0] ss:$0 sps:$4 sm:$0xff]   ;;  %v137_v15 = vrot.slane %v2307_v10, %v2588_v37  ;;  %v2350_v10 = vld [vmem:[#allocation2 + $0x20] ss:$12 sps:$4 sm:$0xff]  }
  0x8f   :  { %1188 = vmatprep.subr.bf16.mxu1 %v2483_v39  ;;  %v1055_v25 = vsel %vm1053_vm1, %v2301_v14, 0  ;;  %v2347_v14 = vld [vmem:[#allocation6 + $0x178] sm:$0xff]  }
  0x91   :  { %2022 = vmatpush3.bf16.msra.mxu0 %v2259_v16  ;;  %v151_v16 = vrot.slane %v2309_v11, %v2588_v37 }
  0x92   :  { %2023 = vmatprep.subr.bf16.mxu0 %v2261_v17  ;;  %1189 = vmatpush1.bf16.msra.mxu1 %v2260_v18  ;;  %v191_v17 = vrot.slane %v2311_v12, %v2588_v37  ;;  %v2302_v18 = vld [vmem:[#allocation6 + $0x30] sm:$0xff]  }
  0x93   :  { %1190 = vmatprep.subr.bf16.mxu1 %v2483_v39  ;;  %v159_v27 = vcombine.low %v137_v15, %v151_v16 }
  0x95   :  { %2024 = vmatpush3.bf16.msra.mxu0 %v2262_v19  ;;  %v205_v19 = vrot.slane %v2313_v13, %v2588_v37 }
  0x96   :  { %2025 = vmatprep.subr.bf16.mxu0 %v2264_v21  ;;  %1191 = vmatpush1.bf16.msra.mxu1 %v2263_v20  ;;  %v355_v20 = vcombine.low %v2607_v35, %v2611_v40  ;;  %v427_v21 = vcombine.low %v2614_v41, %v2619_v45  ;;  %v2317_v40 = vld [vmem:[#allocation6 + $0x88] sm:$0xff]   ;;  %v2319_v41 = vld [vmem:[#allocation6 + $0xd0] sm:$0xff]   ;;  %v2323_v45 = vld [vmem:[#allocation6 + $0xd8] sm:$0xff]  }
  0x97   :  { %1192 = vmatprep.subr.bf16.mxu1 %v2483_v39  ;;  %v214_v24 = vcombine.high %v191_v17, %v205_v19  ;;  %v213_v28 = vcombine.low %v191_v17, %v205_v19  ;;  %v2341_v17 = vld [vmem:[#allocation6 + $0xb8] sm:$0xff]   ;;  %v178_v19 = vrot.slane %v2350_v10, %v2588_v37 }
  0x98   :  { %v451_v31 = vpack.c.bf16 %v427_v21, %v355_v20 }
  0x99   :  { %2026 = vmatpush3.bf16.msra.mxu0 %v2265_v22  ;;  %v2303_v22 = vld [vmem:[#allocation6 + $0x78] sm:$0xff]   ;;  %v247_v35 = vpack.c.bf16 %v213_v28, %v159_v27 }
  0x9a   :  { %2027 = vmatprep.subr.bf16.mxu0 %v2267_v23  ;;  %1193 = vmatpush1.bf16.msra.mxu1 %v2266_v36  ;;  %v160_v23 = vcombine.high %v137_v15, %v151_v16  ;;  %v2315_v36 = vld [vmem:[#allocation6 + $0xc8] sm:$0xff]   ;;  %v2351_v15 = vld [vmem:[#allocation2 + $0x38] ss:$12 sps:$4 sm:$0xff]   ;;  %v2352_v16 = vld [vmem:[#allocation2 + $0x50] ss:$12 sps:$4 sm:$0xff]  }
  0x9b   :  { %1194 = vmatprep.subr.bf16.mxu1 %v2483_v39  ;;  %v225_v20 = vrot.slane %v2351_v15, %v2588_v37  ;;  %v232_v21 = vrot.slane %v2352_v16, %v2588_v37 }
  0x9c   :  { %v248_v30 = vpack.c.bf16 %v214_v24, %v160_v23 }
  0x9d   :  { %2028 = vmatpush3.bf16.msra.mxu0 %v2268_v46  ;;  %v2326_v46 = vld [vmem:[#allocation6 + $0x110] sm:$0xff]   ;;  %v233_v27 = vcombine.low %v225_v20, %v232_v21 }
  0x9e   :  { %2035 = vmatprep.subr.bf16.mxu0 %v2282_v50  ;;  %1195 = vmatpush1.bf16.msra.mxu1 %v2269_v52  ;;  %v2330_v50 = vld [vmem:[#allocation6 + $0x118] sm:$0xff]   ;;  %v2329_v52 = vld [vmem:[#allocation6 + $0xa0] sm:$0xff]  }
  0x9f   :  { %1196 = vmatprep.subr.bf16.mxu1 %v2483_v39 }
  0xa0   :  { %1172 = vmatmul.mubr.bf16.vlgmr.msra.gmra.mrb[4].mxu0 %v449_v54  ;;  %v2333_v54 = vld [vmem:[#allocation6 + $0xa8] sm:$0xff]  }
  0xa1   :  { %2036 = vmatpush3.bf16.msra.mxu0 %v2284_v56  ;;  %1541 = vmatprep.mubr.bf16.mxu0 %v248_v30  ;;  %v2336_v56 = vld [vmem:[#allocation6 + $0x168] sm:$0xff]   ;;  %v1643_v30 = vld [vmem:[#allocation9] sm:$0xff] }
  0xa2   :  { %2037 = vmatprep.subr.bf16.mxu0 %v2285_v57  ;;  %1197 = vmatpush1.bf16.msra.mxu1 %v2283_v58  ;;  %v2335_v57 = vld [vmem:[#allocation6 + $0xf0] sm:$0xff]  }
  0xa3   :  { %1198 = vmatprep.subr.bf16.mxu1 %v2483_v39  ;;  %v2343_v58 = vld [vmem:[#allocation2 + $0x4] ss:$12 sps:$4 sm:$0xff]  }
  0xa5   :  { %2038 = vmatpush3.bf16.msra.mxu0 %v2287_v59  ;;  %v2344_v59 = vld [vmem:[#allocation2 + $0x1c] ss:$12 sps:$4 sm:$0xff]  }
  0xa6   :  { %2039 = vmatprep.subr.bf16.mxu0 %v2288_v60  ;;  %1199 = vmatpush1.bf16.msra.mxu1 %v2286_v61  ;;  %v2345_v60 = vld [vmem:[#allocation2 + $0x34] ss:$12 sps:$4 sm:$0xff]   ;;  %v2346_v61 = vld [vmem:[#allocation2 + $0x4c] ss:$12 sps:$4 sm:$0xff]  }
  0xa7   :  { %1200 = vmatprep.subr.bf16.mxu1 %v2483_v39 }
  0xa9   :  { %2040 = vmatpush3.bf16.msra.mxu0 %v2290_v62  ;;  %v2337_v62 = vld [vmem:[#allocation6 + $0xb0] sm:$0xff]  }
  0xaa   :  { %2041 = vmatprep.subr.bf16.mxu0 %v2291_v63  ;;  %1201 = vmatpush1.bf16.msra.mxu1 %v2289_v0  ;;  %v2338_v63 = vld [vmem:[#allocation6 + $0x128] sm:$0xff]   ;;  %v144_v0 = vrot.slane %v2343_v58, %v2588_v37 }
  0xab   :  { %1202 = vmatprep.subr.bf16.mxu1 %v2483_v39 }
  0xad   :  { %2042 = vmatpush3.bf16.msra.mxu0 %v2293_v1  ;;  %v158_v1 = vrot.slane %v2344_v59, %v2588_v37 }
  0xae   :  { %2043 = vmatprep.subr.bf16.mxu0 %v2294_v2  ;;  %1203 = vmatpush1.bf16.msra.mxu1 %v2292_v3  ;;  %v2339_v2 = vld [vmem:[#allocation6 + $0xf8] sm:$0xff]   ;;  %v2340_v3 = vld [vmem:[#allocation6 + $0x170] sm:$0xff]  }
  0xaf   :  { %1204 = vmatprep.subr.bf16.mxu1 %v2483_v39  ;;  %v161_v12 = vcombine.low %v144_v0, %v158_v1 }
  0xb1   :  { %2044 = vmatpush3.bf16.msra.mxu0 %v2296_v5  ;;  %v212_v5 = vrot.slane %v2346_v61, %v2588_v37 }
  0xb2   :  { %2045 = vmatprep.subr.bf16.mxu0 %v2297_v6  ;;  %1205 = vmatpush1.bf16.msra.mxu1 %v2295_v4  ;;  %v198_v4 = vrot.slane %v2345_v60, %v2588_v37  ;;  %v2342_v6 = vld [vmem:[#allocation6 + $0x130] sm:$0xff]  }
  0xb3   :  { %1206 = vmatprep.subr.bf16.mxu1 %v2483_v39 }
  0xb4   :  { %v215_v13 = vcombine.low %v198_v4, %v212_v5 }
  0xb5   :  { %2046 = vmatpush3.bf16.msra.mxu0 %v2299_v7  ;;  %v162_v7 = vcombine.high %v144_v0, %v158_v1 }
  0xb6   :  { %2047 = vmatprep.subr.bf16.mxu0 %v2300_v8  ;;  %1207 = vmatpush1.bf16.msra.mxu1 %v2298_v9  ;;  %v216_v8 = vcombine.high %v198_v4, %v212_v5  ;;  %v2349_v9 = vld [vmem:[#allocation2 + $0x8] ss:$12 sps:$4 sm:$0xff]  }
  0xb7   :  { %1208 = vmatprep.subr.bf16.mxu1 %v2483_v39  ;;  %v2320_v39 = vld [vmem:[#allocation6 + $0x148] sm:$0xff]  }
  0xb8   :  { %v250_v11 = vpack.c.bf16 %v216_v8, %v162_v7 }
  0xb9   :  { %2048 = vmatpush3.bf16.msra.mxu0 %v2302_v18  ;;  %v171_v18 = vrot.slane %v2349_v9, %v2588_v37  ;;  %v1646_v37 = vld [vmem:[#allocation9 + $0x18] sm:$0xff] }
  0xba   :  { %2049 = vmatprep.subr.bf16.mxu0 %v2303_v22  ;;  %1209 = vmatpush1.bf16.msra.mxu1 %v1055_v25  ;;  %v2348_v22 = vld [vmem:[#allocation6 + $0x138] sm:$0xff]   ;;  %v249_v25 = vpack.c.bf16 %v215_v13, %v161_v12 }
  0xbb   :  { %2057 = vmatprep.subr.bf16.mxu1 %v2304_v26  ;;  %v180_v23 = vcombine.high %v171_v18, %v178_v19  ;;  %v179_v24 = vcombine.low %v171_v18, %v178_v19  ;;  %v234_v26 = vcombine.high %v225_v20, %v232_v21 }
  0xbd   :  { %2050 = vmatpush3.bf16.msra.mxu0 %v2305_v29  ;;  %1213 = vmatmul.mubr.bf16.vlgmr.msra.gmra.mrb[4].mxu1 %v451_v31  ;;  %v252_v28 = vpack.c.bf16 %v234_v26, %v180_v23  ;;  %v251_v29 = vpack.c.bf16 %v233_v27, %v179_v24  ;;  %v1644_v31 = vld [vmem:[#allocation9 + $0x8] sm:$0xff] }
  0xbe   :  { %2079 = vmatprep.subr.bf16.mxu0 %v2316_v32  ;;  %2058 = vmatpush3.bf16.msra.mxu1 %v2306_v34  ;;  %v1645_v32 = vld [vmem:[#allocation9 + $0x10] sm:$0xff]  ;;  %v2154_v34 = vpack.c.bf16 %v1644_v31, %v1643_v30 }
  0xbf   :  { %2059 = vmatprep.subr.bf16.mxu1 %v2315_v36  ;;  %1582 = vmatprep.mubr.bf16.mxu1 %v250_v11  ;;  %v1647_v36 = vld [vmem:[#allocation9 + $0x20] sm:$0xff] }
  0xc0   :  { %1542 = vmatmul.mubr.bf16.vlgmr.msra.gmra.mrb[8].mxu0 %v247_v35  ;;  %v2158_v35 = vpack.c.bf16 %v1646_v37, %v1645_v32 }
  0xc1   :  { %2080 = vmatpush3.bf16.msra.mxu0 %v2318_v38  ;;  %1623 = vmatprep.mubr.bf16.mxu0 %v252_v28  ;;  %v1648_v38 = vld [vmem:[#allocation9 + $0x28] sm:$0xff] }
  0xc2   :  { %2081 = vmatprep.subr.bf16.mxu0 %v2320_v39  ;;  %2060 = vmatpush3.bf16.msra.mxu1 %v2317_v40  ;;  %v2162_v39 = vpack.c.bf16 %v1648_v38, %v1647_v36  ;;  %v1649_v40 = vld [vmem:[#allocation9 + $0x30] sm:$0xff] }
  0xc3   :  { %2061 = vmatprep.subr.bf16.mxu1 %v2319_v41  ;;  %v1650_v41 = vld [vmem:[#allocation9 + $0x38] sm:$0xff] }
  0xc5   :  { %2082 = vmatpush3.bf16.msra.mxu0 %v2322_v42  ;;  %v2166_v42 = vpack.c.bf16 %v1650_v41, %v1649_v40  ;;  %v1962_v40 = vld [vmem:[%s2663_s4] ss:$0 sm:$0xff] }
  0xc6   :  { %2083 = vmatprep.subr.bf16.mxu0 %v2324_v43  ;;  %2062 = vmatpush3.bf16.msra.mxu1 %v2321_v44  ;;  %v1651_v43 = vld [vmem:[#allocation9 + $0x40] sm:$0xff]  ;;  %v1652_v44 = vld [vmem:[#allocation9 + $0x48] sm:$0xff] }
  0xc7   :  { %2063 = vmatprep.subr.bf16.mxu1 %v2323_v45  ;;  %v2170_v45 = vpack.c.bf16 %v1652_v44, %v1651_v43 }
  0xc9   :  { %2084 = vmatpush3.bf16.msra.mxu0 %v2326_v46  ;;  %v1653_v46 = vld [vmem:[#allocation9 + $0x50] sm:$0xff] }
  0xca   :  { %2085 = vmatprep.subr.bf16.mxu0 %v2328_v47  ;;  %2064 = vmatpush3.bf16.msra.mxu1 %v2325_v48  ;;  %v1654_v47 = vld [vmem:[#allocation9 + $0x58] sm:$0xff] }
  0xcb   :  { %2065 = vmatprep.subr.bf16.mxu1 %v2327_v49  ;;  %v2174_v48 = vpack.c.bf16 %v1654_v47, %v1653_v46  ;;  %v1655_v49 = vld [vmem:[#allocation9 + $0x60] sm:$0xff] }
  0xcd   :  { %2086 = vmatpush3.bf16.msra.mxu0 %v2330_v50  ;;  %v1656_v50 = vld [vmem:[#allocation9 + $0x68] sm:$0xff] }
  0xce   :  { %2087 = vmatprep.subr.bf16.mxu0 %v2332_v51  ;;  %2066 = vmatpush3.bf16.msra.mxu1 %v2329_v52  ;;  %v2178_v51 = vpack.c.bf16 %v1656_v50, %v1655_v49  ;;  %v1657_v52 = vld [vmem:[#allocation9 + $0x70] sm:$0xff]  ;;  %v2484_v49 = vmov 1966171168  }
  0xcf   :  { %2067 = vmatprep.subr.bf16.mxu1 %v2331_v53  ;;  %v1658_v53 = vld [vmem:[#allocation9 + $0x78] sm:$0xff]  ;;  %v1745_v50 = vunpack.c.l.s4 %v2484_v49 }
  0xd1   :  { %2088 = vmatpush3.bf16.msra.mxu0 %v2334_v55 }
  0xd2   :  { %2089 = vmatprep.subr.bf16.mxu0 %v2336_v56  ;;  %2068 = vmatpush3.bf16.msra.mxu1 %v2333_v54  ;;  %v2182_v54 = vpack.c.bf16 %v1658_v53, %v1657_v52  ;;  %v1963_v52 = vld [vmem:[%s2665_s6] ss:$0 sm:$0xff] }
  0xd3   :  { %2069 = vmatprep.subr.bf16.mxu1 %v2335_v57 }
  0xd5   :  { %2090 = vmatpush3.bf16.msra.mxu0 %v2338_v63 }
  0xd6   :  { %2091 = vmatprep.subr.bf16.mxu0 %v2340_v3  ;;  %2070 = vmatpush3.bf16.msra.mxu1 %v2337_v62 }
  0xd7   :  { %2071 = vmatprep.subr.bf16.mxu1 %v2339_v2 }
  0xd9   :  { %2092 = vmatpush3.bf16.msra.mxu0 %v2342_v6 }
  0xda   :  { %2093 = vmatprep.subr.bf16.mxu0 %v2347_v14  ;;  %2072 = vmatpush3.bf16.msra.mxu1 %v2341_v17 }
  0xdb   :  { %2155 = vmatprep.subr.bf16.mxu1 %v2154_v34 }
  0xdd   :  { %2094 = vmatpush3.bf16.msra.mxu0 %v2348_v22  ;;  %1583 = vmatmul.mubr.bf16.vlgmr.msra.gmra.mrb[8].mxu1 %v249_v25 }
  0xde   :  { %2157 = vmatpush3.bf16.msra.mxu1 %v2154_v34 }
  0xdf   :  { %2159 = vmatprep.subr.bf16.mxu1 %v2158_v35 }
  0xe0   :  { %1624 = vmatmul.mubr.bf16.vlgmr.msra.gmra.mrb[12].mxu0 %v251_v29 }
  0xe2   :  { %2161 = vmatpush3.bf16.msra.mxu1 %v2158_v35 }
  0xe3   :  { %2163 = vmatprep.subr.bf16.mxu1 %v2162_v39 }
  0xe6   :  { %2165 = vmatpush3.bf16.msra.mxu1 %v2162_v39 }
  0xe7   :  { %2167 = vmatprep.subr.bf16.mxu1 %v2166_v42 }
  0xea   :  { %2169 = vmatpush3.bf16.msra.mxu1 %v2166_v42 }
  0xeb   :  { %2171 = vmatprep.subr.bf16.mxu1 %v2170_v45 }
  0xee   :  { %2173 = vmatpush3.bf16.msra.mxu1 %v2170_v45 }
  0xef   :  { %2175 = vmatprep.subr.bf16.mxu1 %v2174_v48 }
  0xf2   :  { %2177 = vmatpush3.bf16.msra.mxu1 %v2174_v48 }
  0xf3   :  { %2179 = vmatprep.subr.bf16.mxu1 %v2178_v51 }
  0xf6   :  { %2181 = vmatpush3.bf16.msra.mxu1 %v2178_v51  ;;  %v1746_v51 = vunpack.c.0.s8 %v1745_v50 }
  0xf7   :  { %2183 = vmatprep.subr.bf16.mxu1 %v2182_v54 }
  0xfa   :  { %2185 = vmatpush3.bf16.msra.mxu1 %v2182_v54 }
 0x153   :  { %v1985_v55 = vpop.f32.mrb[0].mxu0 }
 0x154   :  { %v1986_v56 = vpop.f32.mrb[1].mxu0  ;;  %v2007_v57 = vpop.f32.mrb[0].mxu1 }
 0x155   :  { %v1987_v58 = vadd.f32 %v1986_v56, %v1985_v55  ;;  %v1988_v59 = vpop.f32.mrb[2].mxu0  ;;  %v2008_v60 = vpop.f32.mrb[1].mxu1  ;;  %v1749_v55 = vsub.s32 %v1746_v51, %v2585_v33 }
 0x156   :  { %v1989_v61 = vpop.f32.mrb[3].mxu0  ;;  %v2009_v62 = vadd.f32 %v2008_v60, %v2007_v57  ;;  %v2010_v63 = vpop.f32.mrb[2].mxu1 }
 0x157   :  { %v1990_v0 = vadd.f32 %v1989_v61, %v1988_v59  ;;  %v2011_v1 = vpop.f32.mrb[3].mxu1 }
 0x158   :  { %v1133_v2 = vadd.f32 %v2009_v62, %v1987_v58  ;;  %v2012_v3 = vadd.f32 %v2011_v1, %v2010_v63 }
 0x15a   :  { %v1136_v4 = vadd.f32 %v2012_v3, %v1990_v0 }
 0x173   :  { %v2029_v5 = vpop.f32.mrb[4].mxu0 }
 0x174   :  { %v2030_v6 = vpop.f32.mrb[5].mxu0 }
 0x175   :  { %v2031_v7 = vadd.f32 %v2030_v6, %v2029_v5  ;;  %v2032_v8 = vpop.f32.mrb[6].mxu0 }
 0x176   :  { %v2033_v9 = vpop.f32.mrb[7].mxu0 }
 0x177   :  { %v2034_v10 = vadd.f32 %v2033_v9, %v2032_v8  ;;  %v1174_v11 = vadd.f32 %v2031_v7, %v1133_v2 }
 0x179   :  { %v1177_v12 = vadd.f32 %v2034_v10, %v1136_v4 }
 0x190   :  { %v1214_v13 = vpop.f32.mrb[4].mxu1 }
 0x191   :  { %v1215_v14 = vadd.f32 %v1214_v13, %v1174_v11  ;;  %v1216_v15 = vpop.f32.mrb[5].mxu1 }
 0x192   :  { %v1217_v16 = vpop.f32.mrb[6].mxu1 }
 0x193   :  { %v2051_v17 = vpop.f32.mrb[8].mxu0  ;;  %v1218_v18 = vadd.f32 %v1217_v16, %v1177_v12  ;;  %v1219_v19 = vpop.f32.mrb[7].mxu1 }
 0x194   :  { %v2052_v20 = vpop.f32.mrb[9].mxu0 }
 0x195   :  { %v2053_v21 = vadd.f32 %v2052_v20, %v2051_v17  ;;  %v2054_v22 = vpop.f32.mrb[10].mxu0 }
 0x196   :  { %v2055_v23 = vpop.f32.mrb[11].mxu0 }
 0x197   :  { %v1544_v24 = vadd.f32 %v2053_v21, %v1215_v14  ;;  %v2056_v25 = vadd.f32 %v2055_v23, %v2054_v22 }
 0x199   :  { %v1547_v26 = vadd.f32 %v2056_v25, %v1218_v18 }
 0x1b0   :  { %v2073_v27 = vpop.f32.mrb[8].mxu1 }
 0x1b1   :  { %v2074_v28 = vpop.f32.mrb[9].mxu1 }
 0x1b2   :  { %v2075_v29 = vadd.f32 %v2074_v28, %v2073_v27  ;;  %v2076_v30 = vpop.f32.mrb[10].mxu1 }
 0x1b3   :  { %v2095_v31 = vpop.f32.mrb[12].mxu0  ;;  %v2077_v32 = vpop.f32.mrb[11].mxu1 }
 0x1b4   :  { %v2096_v34 = vpop.f32.mrb[13].mxu0  ;;  %v1585_v37 = vadd.f32 %v2075_v29, %v1544_v24  ;;  %v2078_v35 = vadd.f32 %v2077_v32, %v2076_v30 }
 0x1b5   :  { %v2097_v36 = vadd.f32 %v2096_v34, %v2095_v31  ;;  %v2098_v38 = vpop.f32.mrb[14].mxu0 }
 0x1b6   :  { %v2099_v39 = vpop.f32.mrb[15].mxu0  ;;  %v1588_v41 = vadd.f32 %v2078_v35, %v1547_v26 }
 0x1b7   :  { %v1626_v42 = vadd.f32 %v2097_v36, %v1585_v37  ;;  %v2100_v43 = vadd.f32 %v2099_v39, %v2098_v38 }
 0x1b9   :  { %v1629_v44 = vadd.f32 %v2100_v43, %v1588_v41  ;;  %v1639_v45 = vadd.f32 %v1962_v40, %v1626_v42 }
 0x1bb   :  { %v1640_v46 = vadd.f32 %v1962_v40, %v1629_v44  ;;  %v1641_v47 = vmax.f32 %v1639_v45, 0.0 }
 0x1bd   :  { %v1642_v48 = vmax.f32 %v1640_v46, 0.0  ;;  %2151 = vmatprep.mubr.f32.mxu1 %v1641_v47 }
 0x1bf   :  { %2152 = vmatmul.mubr.f32.vlgmr.msra.gmra.mrb[12].mxu1 %v1642_v48 }
 0x292   :  { %v2153_v53 = vpop.f32.mrb[12].mxu1 }
 0x293   :  { %v1738_v54 = vadd.f32 %v2153_v53, %v1963_v52  ;;  %v1732_v56 = vpop.f32.mrb[13].mxu1 }
 0x294   :  { %v1733_v57 = vadd.f32 %v1963_v52, %v1732_v56 }
 0x296   :  { %v1741_v58 = vpack.c.bf16 %v1738_v54, %v1733_v57 }
 0x298   :  { %v1750_v59 = vrot.slane %v1741_v58, %v1749_v55 }
 0x29a   :  { %1965 = vst.sshfl [vmem:[#allocation10] sm:$0x1 pattern:$0x73625140] %v1750_v59 }
 0x2a1   :  { %v1825_v60 = vld [vmem:[#allocation10] sm:$0x1] }
 0x2a2   :  { %1826 = vst [vmem:[%s2666_s7] sm:$0x1] %v1825_v60 }
 0x2a3   :  { %1843 = vsyncpa [#allocation3], 1 }
 0x2a4   :  { %1844 = vsyncpa [#allocation5], 1 }
 0x2a5   :  { %1845 = vsyncpa [#allocation8], 1 }

</bundles_post_ra>
